<compile_context>
chip_gen: v6e
topology: v6e:2x2x1
jax: 0.10.0
libtpu: 0.0.40
codegen_flags: <defaults>
</compile_context>

<pallas_src>
import functools

import jax
import jax.numpy as jnp
from jax import lax
from jax.experimental import pallas as pl
from jax.experimental.pallas import tpu as pltpu


_EPS = 1e-12  # torch.nn.functional.normalize default eps


# ---------------------------------------------------------------------------
# Pass 1: row-wise L2 normalization (each row normalized exactly once).
# ---------------------------------------------------------------------------
def _normalize_kernel(fc_ref, out_ref):
    x = fc_ref[...].astype(jnp.float32)
    sumsq = jnp.sum(x * x, axis=-1, keepdims=True)
    # rsqrt(max(sumsq, eps^2)) == 1 / max(||x||, eps)  (matches F.normalize;
    # all-zero padding rows map to exactly 0).
    inv = lax.rsqrt(jnp.maximum(sumsq, _EPS * _EPS))
    out_ref[...] = (x * inv).astype(out_ref.dtype)


# ---------------------------------------------------------------------------
# Pass 2: tiled similarity + squared-hinge reduction (upper triangle only).
# ---------------------------------------------------------------------------
def _spreadout_kernel(row_ref, col_ref, out_ref, acc_ref, *, margin, tile):
    i = pl.program_id(0)
    j = pl.program_id(1)
    nj = pl.num_programs(1)

    @pl.when(j == 0)
    def _init():
        acc_ref[...] = jnp.zeros_like(acc_ref)

    def _accumulate(diag_tile):
        # (tile, D) @ (tile, D)^T via transposed-RHS contraction (no explicit .T)
        sim = lax.dot_general(
            row_ref[...], col_ref[...],
            dimension_numbers=(((1,), (1,)), ((), ())),
            preferred_element_type=jnp.float32)               # (tile, tile) f32
        hinge = jnp.maximum(sim - margin, 0.0)
        sq = hinge * hinge
        if diag_tile:
            # Only the nblk diagonal tiles pay for the iota mask.
            r = lax.broadcasted_iota(jnp.int32, (tile, tile), 0)
            c = lax.broadcasted_iota(jnp.int32, (tile, tile), 1)
            sq = jnp.where(r != c, sq, 0.0)
            weight = 1.0
        else:
            weight = 2.0                         # symmetry: mirror tile counted here
        # Fold sublane groups with pure VPU adds; no per-tile cross-lane reduce.
        part = jnp.sum(sq.reshape(tile // 8, 8, tile), axis=0)    # (8, tile)
        acc_ref[...] += weight * part

    @pl.when(j == i)
    def _diag():
        _accumulate(True)

    @pl.when(j > i)
    def _off_diag():
        _accumulate(False)

    @pl.when(j == nj - 1)
    def _finalize():
        # Collapse lane groups (<= 3 VPU adds) into one lane-dense (8, 128)
        # partial block; the wrapper sums all blocks.
        acc = acc_ref[...]
        total = acc[:, 0:128]
        for k in range(1, tile // 128):
            total = total + acc[:, k * 128:(k + 1) * 128]
        out_ref[...] = total


def _pick_tile(n):
    # Big tiles keep Pass 2 MXU-bound (arithmetic intensity ~ tile flop/byte in
    # bf16).  512 is a solid default on v5e/v6e/v7x; on v6e (128 MiB VMEM,
    # high MXU/HBM ratio) tile=1024 can be passed explicitly via `tile=`.
    for t in (512, 256, 128):
        if n >= t:
            return t
    return 128


def spreadout_loss(fc, *, margin=0.7, mode="sum", tile=None,
                   compute_dtype=jnp.bfloat16):
    """Pallas TPU implementation of SpreadOut_Module.forward().

    compute_dtype=bf16 (default) feeds the MXU at native rate with f32
    accumulation; values are unit-normalized so this is numerically benign,
    but pass compute_dtype=jnp.float32 if an exact-precision loss is needed.
    """
    fc = jnp.asarray(fc)
    n, d = fc.shape
    if tile is None:
        tile = _pick_tile(n)
    assert tile % 128 == 0, "tile must be a multiple of 128"

    # Pad N up to a multiple of the tile with zero rows (made loss-neutral by an
    # exact correction below) so the fast tiled path is always taken.
    n_pad = ((n + tile - 1) // tile) * tile
    if n_pad != n:
        fc = jnp.pad(fc, ((0, n_pad - n), (0, 0)))
    nblk = n_pad // tile

    # ---------------- Pass 1: normalize each row exactly once ----------------
    fcn = pl.pallas_call(
        _normalize_kernel,
        out_shape=jax.ShapeDtypeStruct((n_pad, d), compute_dtype),
        grid_spec=pltpu.PrefetchScalarGridSpec(
            num_scalar_prefetch=0,
            grid=(nblk,),
            in_specs=[pl.BlockSpec((tile, d), lambda i: (i, 0))],
            out_specs=pl.BlockSpec((tile, d), lambda i: (i, 0)),
        ),
        compiler_params=pltpu.CompilerParams(
            dimension_semantics=("parallel",)),
    )(fc)

    # ------ Pass 2: tiled similarity + hinge^2 reduction (j >= i only) -------
    kernel = functools.partial(_spreadout_kernel, margin=float(margin),
                               tile=tile)
    partials = pl.pallas_call(
        kernel,
        out_shape=jax.ShapeDtypeStruct((8, nblk * 128), jnp.float32),
        grid_spec=pltpu.PrefetchScalarGridSpec(
            num_scalar_prefetch=0,
            grid=(nblk, nblk),
            in_specs=[
                # Row tile of the normalized FC.
                pl.BlockSpec((tile, d), lambda i, j: (i, 0)),
                # Col tile: max(i, j) keeps the block index constant across the
                # skipped lower-triangle steps -> no DMA is issued for them.
                pl.BlockSpec((tile, d), lambda i, j: (jnp.maximum(i, j), 0)),
            ],
            out_specs=pl.BlockSpec((8, 128), lambda i, j: (0, i)),
            scratch_shapes=[pltpu.VMEM((8, tile), jnp.float32)],
        ),
        compiler_params=pltpu.CompilerParams(
            dimension_semantics=("parallel", "arbitrary"),
            vmem_limit_bytes=48 * 1024 * 1024),  # headroom even on v7x (64 MiB)
    )(fcn, fcn)

    loss = jnp.sum(partials)

    # Exact removal of the zero-padded rows: padded rows normalize to exactly 0,
    # so each off-diagonal pair touching them contributes relu(0 - margin)^2
    # (zero whenever margin > 0).
    pad_pairs = n_pad * (n_pad - 1) - n * (n - 1)
    if pad_pairs:
        pad_hinge = max(-float(margin), 0.0)
        loss = loss - jnp.float32(pad_pairs) * jnp.float32(pad_hinge * pad_hinge)

    if mode == "mean":
        loss = loss / jnp.float32(n * (n - 1))  # number of off-diagonal elems
    return loss


def _reference(fc, margin=0.7, mode="sum"):
    fc = fc.astype(jnp.float32)
    norm = jnp.sqrt(jnp.sum(fc * fc, axis=-1, keepdims=True))
    fcn = fc / jnp.maximum(norm, _EPS)
    # Exact f32 similarity (broadcast multiply + reduce: no MXU precision
    # ambiguity in the reference).
    sim = jnp.sum(fcn[:, None, :] * fcn[None, :, :], axis=-1)
    n = fc.shape[0]
    off = ~jnp.eye(n, dtype=bool)
    hinge = jnp.maximum(sim - margin, 0.0)
    vals = jnp.where(off, hinge * hinge, 0.0)
    if mode == "sum":
        return jnp.sum(vals)
    return jnp.sum(vals) / (n * (n - 1))


if __name__ == "__main__":
    # Deterministic synthetic parameter: all_FC has shape (N, D) = (16, 32).
    key = jax.random.PRNGKey(0)
    n, d = 16, 32
    all_fc = jax.random.normal(key, (n, d), dtype=jnp.float32)

    # f32 compute path, both reduction modes, two margins (single padded tile).
    for margin in (0.7, 0.1):
        for mode in ("sum", "mean"):
            got = jax.block_until_ready(
                spreadout_loss(all_fc, margin=margin, mode=mode,
                               compute_dtype=jnp.float32))
            want = _reference(all_fc, margin, mode)
            assert jnp.allclose(got, want, rtol=5e-2, atol=1e-3), (
                margin, mode, got, want)

    # Multi-tile grid: exercises symmetry weighting, the diagonal/off-diagonal
    # split, zero-row padding (300 -> 384) and the negative-margin correction.
    n2, d2 = 300, 64
    fc2 = jax.random.normal(jax.random.PRNGKey(1), (n2, d2), dtype=jnp.float32)
    for margin in (0.1, -0.2):
        got = jax.block_until_ready(
            spreadout_loss(fc2, margin=margin, mode="sum", tile=128,
                           compute_dtype=jnp.float32))
        want = _reference(fc2, margin, "sum")
        assert jnp.allclose(got, want, rtol=5e-2, atol=1e-2), (margin, got, want)

    # Default bf16 MXU fast path (f32 accumulation), relaxed tolerance.
    got_bf16 = jax.block_until_ready(
        spreadout_loss(all_fc, margin=0.1, mode="sum"))
    assert jnp.allclose(got_bf16, _reference(all_fc, 0.1, "sum"),
                        rtol=1e-1, atol=1e-2), got_bf16

    print("KERNEL_OK")
</pallas_src>

<mosaic_0001>
module attributes {stable_mosaic.version = 11 : i64} {
  func.func @_normalize_kernel(%arg0: i32, %arg1: memref<128x32xf32, #tpu.memory_space<vmem>>, %arg2: memref<128x32xf32, #tpu.memory_space<vmem>>) attributes {dimension_semantics = [#tpu.dimension_semantics<parallel>], iteration_bounds = array<i64: 1>, scalar_prefetch = 0 : i64, scratch_operands = 0 : i64, tpu.core_type = #tpu.core_type<tc>, window_params = [{transform_indices = @transform_0, window_bounds = array<i64: 128, 32>}, {transform_indices = @transform_1, window_bounds = array<i64: 128, 32>}]} {
    %c0 = arith.constant 0 : index
    %c0_0 = arith.constant 0 : index
    %0 = vector.load %arg1[%c0, %c0_0] : memref<128x32xf32, #tpu.memory_space<vmem>>, vector<128x32xf32>
    %1 = arith.mulf %0, %0 : vector<128x32xf32>
    %cst = arith.constant dense<0.000000e+00> : vector<128xf32>
    %2 = vector.multi_reduction <add>, %1, %cst [1] : vector<128x32xf32> to vector<128xf32>
    %3 = vector.shape_cast %2 : vector<128xf32> to vector<128x1xf32>
    %cst_1 = arith.constant 1.000000e-24 : f32
    %4 = vector.broadcast %cst_1 : f32 to vector<128x1xf32>
    %5 = arith.maximumf %3, %4 : vector<128x1xf32>
    %6 = math.rsqrt %5 : vector<128x1xf32>
    %7 = vector.broadcast %6 : vector<128x1xf32> to vector<128x32xf32>
    %8 = arith.mulf %0, %7 : vector<128x32xf32>
    %c0_2 = arith.constant 0 : index
    %c0_3 = arith.constant 0 : index
    %9 = vector.load %arg2[%c0_2, %c0_3] : memref<128x32xf32, #tpu.memory_space<vmem>>, vector<128x32xf32>
    tpu.vector_store %arg2[%c0_2, %c0_3], %8 {strides = array<i32>} : memref<128x32xf32, #tpu.memory_space<vmem>>, vector<128x32xf32>,
    return
  }
  func.func @transform_0(%arg0: i32) -> (i32, i32) {
    %c0_i32 = arith.constant 0 : i32
    %c0_i32_0 = arith.constant 0 : i32
    return %arg0, %c0_i32 : i32, i32
  }
  func.func @transform_1(%arg0: i32) -> (i32, i32) {
    %c0_i32 = arith.constant 0 : i32
    %c0_i32_0 = arith.constant 0 : i32
    return %arg0, %c0_i32 : i32, i32
  }
}

</mosaic_0001>

<bundles_post_ra>
// kernel: tpu_custom_call.1
= control target key start
LH: loop header
LB: loop body
LE: loop exit
PB: predicated region body
PF: predicated region fallthrough
CT: control target
= control target key end

     0   :  { %vm40_vm0 = vcmask 261120   ;;  %s407_s0 = inlined_call_operand.vmem [shape: f32[128,32], index: 0, kind: input, shape index: {}]   ;;  %s408_s1 = inlined_call_operand.vmem [shape: f32[128,32], index: 1, kind: output, shape index: {}]  }
   0x1   :  { %v202_v0 = vld [vmem:[%s407_s0 + $0x10] sm:$0xff]  ;;  %v207_v1 = vld [vmem:[%s407_s0] sm:$0xff]  ;;  %v212_v2 = vld [vmem:[%s407_s0 + $0x18] sm:$0xff] }
   0x2   :  { %v26_v3 = vmul.f32 %v202_v0, %v202_v0  ;;  %v24_v4 = vmul.f32 %v207_v1, %v207_v1  ;;  %v27_v5 = vmul.f32 %v212_v2, %v212_v2  ;;  %v223_v6 = vld [vmem:[%s407_s0 + $0x8] sm:$0xff]  ;;  %v235_v9 = vld [vmem:[%s407_s0 + $0x20] sm:$0xff]  ;;  %v248_v16 = vld [vmem:[%s407_s0 + $0x38] sm:$0xff] }
   0x3   :  { %v25_v7 = vmul.f32 %v223_v6, %v223_v6  ;;  %v230_v8 = vld [vmem:[%s407_s0 + $0x28] sm:$0xff]  ;;  %v28_v15 = vmul.f32 %v235_v9, %v235_v9  ;;  %v253_v17 = vld [vmem:[%s407_s0 + $0x30] sm:$0xff]  ;;  %v31_v20 = vmul.f32 %v248_v16, %v248_v16  ;;  %v269_v23 = vld [vmem:[%s407_s0 + $0x40] sm:$0xff] }
   0x4   :  { %v47_v10 = vsel %vm40_vm0, %v26_v3, 0.0  ;;  %v41_v11 = vsel %vm40_vm0, %v24_v4, 0.0  ;;  %v50_v12 = vsel %vm40_vm0, %v27_v5, 0.0  ;;  %v29_v14 = vmul.f32 %v230_v8, %v230_v8  ;;  %v264_v22 = vld [vmem:[%s407_s0 + $0x48] sm:$0xff]  ;;  %v280_v28 = vld [vmem:[%s407_s0 + $0x58] sm:$0xff]  ;;  %v285_v29 = vld [vmem:[%s407_s0 + $0x50] sm:$0xff] }
   0x5   :  { %48 = vadd.xlane.f32.xlu1 %v47_v10  ;;  %42 = vadd.xlane.f32.xlu0 %v41_v11  ;;  %v44_v13 = vsel %vm40_vm0, %v25_v7, 0.0  ;;  %v53_v19 = vsel %vm40_vm0, %v28_v15, 0.0  ;;  %v30_v21 = vmul.f32 %v253_v17, %v253_v17  ;;  %v62_v24 = vsel %vm40_vm0, %v31_v20, 0.0  ;;  %v296_v34 = vld [vmem:[%s407_s0 + $0x68] sm:$0xff]  ;;  %v301_v35 = vld [vmem:[%s407_s0 + $0x60] sm:$0xff]  ;;  %v312_v40 = vld [vmem:[%s407_s0 + $0x78] sm:$0xff] }
   0x6   :  { %v56_v18 = vsel %vm40_vm0, %v29_v14, 0.0  ;;  %v33_v26 = vmul.f32 %v264_v22, %v264_v22  ;;  %v32_v27 = vmul.f32 %v269_v23, %v269_v23  ;;  %v35_v32 = vmul.f32 %v280_v28, %v280_v28  ;;  %v317_v41 = vld [vmem:[%s407_s0 + $0x70] sm:$0xff] }
   0x7   :  { %v59_v25 = vsel %vm40_vm0, %v30_v21, 0.0  ;;  %v34_v33 = vmul.f32 %v285_v29, %v285_v29  ;;  %v37_v38 = vmul.f32 %v296_v34, %v296_v34  ;;  %v36_v39 = vmul.f32 %v301_v35, %v301_v35 }
   0x8   :  { %v68_v30 = vsel %vm40_vm0, %v33_v26, 0.0  ;;  %v65_v31 = vsel %vm40_vm0, %v32_v27, 0.0  ;;  %v74_v36 = vsel %vm40_vm0, %v35_v32, 0.0  ;;  %v39_v44 = vmul.f32 %v312_v40, %v312_v40 }
   0x9   :  { %51 = vadd.xlane.f32.xlu1 %v50_v12  ;;  %45 = vadd.xlane.f32.xlu0 %v44_v13  ;;  %v71_v37 = vsel %vm40_vm0, %v34_v33, 0.0  ;;  %v80_v42 = vsel %vm40_vm0, %v37_v38, 0.0  ;;  %v77_v43 = vsel %vm40_vm0, %v36_v39, 0.0  ;;  %v38_v45 = vmul.f32 %v317_v41, %v317_v41 }
   0xa   :  { %v86_v46 = vsel %vm40_vm0, %v39_v44, 0.0 }
   0xb   :  { %v83_v47 = vsel %vm40_vm0, %v38_v45, 0.0 }
   0xd   :  { %57 = vadd.xlane.f32.xlu1 %v56_v18  ;;  %54 = vadd.xlane.f32.xlu0 %v53_v19 }
  0x11   :  { %63 = vadd.xlane.f32.xlu1 %v62_v24  ;;  %60 = vadd.xlane.f32.xlu0 %v59_v25 }
  0x15   :  { %69 = vadd.xlane.f32.xlu1 %v68_v30  ;;  %66 = vadd.xlane.f32.xlu0 %v65_v31 }
  0x19   :  { %75 = vadd.xlane.f32.xlu1 %v74_v36  ;;  %72 = vadd.xlane.f32.xlu0 %v71_v37 }
  0x1d   :  { %81 = vadd.xlane.f32.xlu1 %v80_v42  ;;  %78 = vadd.xlane.f32.xlu0 %v77_v43 }
  0x21   :  { %87 = vadd.xlane.f32.xlu1 %v86_v46  ;;  %84 = vadd.xlane.f32.xlu0 %v83_v47 }
  0x8e   :  { %v49_v48 = vpop.xlane.xlu1 %48  ;;  %v43_v49 = vpop.xlane.xlu0 %42 }
  0x8f   :  { %v91_v50 = vmax.f32 %v49_v48, 1e-24  ;;  %v89_v51 = vmax.f32 %v43_v49, 1e-24 }
  0x91   :  { %157 = vrsqrt.f32 %v91_v50 }
  0x92   :  { %159 = vrsqrt.f32 %v89_v51  ;;  %v52_v52 = vpop.xlane.xlu1 %51  ;;  %v46_v53 = vpop.xlane.xlu0 %45 }
  0x93   :  { %v92_v54 = vmax.f32 %v52_v52, 1e-24  ;;  %v90_v55 = vmax.f32 %v46_v53, 1e-24 }
  0x95   :  { %161 = vrsqrt.f32 %v92_v54 }
  0x96   :  { %163 = vrsqrt.f32 %v90_v55  ;;  %v58_v56 = vpop.xlane.xlu1 %57  ;;  %v55_v57 = vpop.xlane.xlu0 %54 }
  0x97   :  { %v94_v58 = vmax.f32 %v58_v56, 1e-24  ;;  %v93_v59 = vmax.f32 %v55_v57, 1e-24 }
  0x99   :  { %165 = vrsqrt.f32 %v94_v58 }
  0x9a   :  { %167 = vrsqrt.f32 %v93_v59  ;;  %v64_v60 = vpop.xlane.xlu1 %63  ;;  %v61_v61 = vpop.xlane.xlu0 %60 }
  0x9b   :  { %v96_v62 = vmax.f32 %v64_v60, 1e-24  ;;  %v95_v63 = vmax.f32 %v61_v61, 1e-24 }
  0x9d   :  { %169 = vrsqrt.f32 %v96_v62 }
  0x9e   :  { %v158_v3 = vpop.eup %157  ;;  %171 = vrsqrt.f32 %v95_v63  ;;  %v70_v4 = vpop.xlane.xlu1 %69 }
  0x9f   :  { %v67_v5 = vpop.xlane.xlu0 %66  ;;  %v160_v7 = vpop.eup %159  ;;  %v123_v10 = vmul.f32 %v158_v3, %v202_v0  ;;  %v98_v11 = vmax.f32 %v70_v4, 1e-24 }
  0xa0   :  { %v97_v12 = vmax.f32 %v67_v5, 1e-24  ;;  %v121_v13 = vmul.f32 %v160_v7, %v207_v1 }
  0xa1   :  { %139 = vst.msk [vmem:[%s408_s1 + $0x10] sm:$0xff] %vm40_vm0, %v123_v10  ;;  %173 = vrsqrt.f32 %v98_v11 }
  0xa2   :  { %v162_v14 = vpop.eup %161  ;;  %137 = vst.msk [vmem:[%s408_s1] sm:$0xff] %vm40_vm0, %v121_v13  ;;  %175 = vrsqrt.f32 %v97_v12  ;;  %v76_v15 = vpop.xlane.xlu1 %75 }
  0xa3   :  { %v73_v18 = vpop.xlane.xlu0 %72  ;;  %v164_v0 = vpop.eup %163  ;;  %v124_v19 = vmul.f32 %v162_v14, %v212_v2  ;;  %v100_v20 = vmax.f32 %v76_v15, 1e-24 }
  0xa4   :  { %v99_v1 = vmax.f32 %v73_v18, 1e-24  ;;  %v122_v21 = vmul.f32 %v164_v0, %v223_v6 }
  0xa5   :  { %140 = vst.msk [vmem:[%s408_s1 + $0x18] sm:$0xff] %vm40_vm0, %v124_v19  ;;  %177 = vrsqrt.f32 %v100_v20 }
  0xa6   :  { %v166_v24 = vpop.eup %165  ;;  %138 = vst.msk [vmem:[%s408_s1 + $0x8] sm:$0xff] %vm40_vm0, %v122_v21  ;;  %179 = vrsqrt.f32 %v99_v1  ;;  %v82_v25 = vpop.xlane.xlu1 %81 }
  0xa7   :  { %v79_v26 = vpop.xlane.xlu0 %78  ;;  %v168_v2 = vpop.eup %167  ;;  %v126_v27 = vmul.f32 %v166_v24, %v230_v8  ;;  %v102_v30 = vmax.f32 %v82_v25, 1e-24 }
  0xa8   :  { %v101_v6 = vmax.f32 %v79_v26, 1e-24  ;;  %v125_v31 = vmul.f32 %v168_v2, %v235_v9 }
  0xa9   :  { %142 = vst.msk [vmem:[%s408_s1 + $0x28] sm:$0xff] %vm40_vm0, %v126_v27  ;;  %181 = vrsqrt.f32 %v102_v30 }
  0xaa   :  { %v170_v32 = vpop.eup %169  ;;  %141 = vst.msk [vmem:[%s408_s1 + $0x20] sm:$0xff] %vm40_vm0, %v125_v31  ;;  %183 = vrsqrt.f32 %v101_v6  ;;  %v88_v33 = vpop.xlane.xlu1 %87 }
  0xab   :  { %v85_v36 = vpop.xlane.xlu0 %84  ;;  %v172_v8 = vpop.eup %171  ;;  %v128_v37 = vmul.f32 %v170_v32, %v248_v16  ;;  %v104_v38 = vmax.f32 %v88_v33, 1e-24 }
  0xac   :  { %v103_v9 = vmax.f32 %v85_v36, 1e-24  ;;  %v127_v39 = vmul.f32 %v172_v8, %v253_v17 }
  0xad   :  { %144 = vst.msk [vmem:[%s408_s1 + $0x38] sm:$0xff] %vm40_vm0, %v128_v37  ;;  %185 = vrsqrt.f32 %v104_v38 }
  0xae   :  { %v174_v42 = vpop.eup %173  ;;  %143 = vst.msk [vmem:[%s408_s1 + $0x30] sm:$0xff] %vm40_vm0, %v127_v39  ;;  %187 = vrsqrt.f32 %v103_v9 }
  0xaf   :  { %v176_v43 = vpop.eup %175  ;;  %v130_v16 = vmul.f32 %v174_v42, %v264_v22 }
  0xb0   :  { %v129_v44 = vmul.f32 %v176_v43, %v269_v23 }
  0xb1   :  { %146 = vst.msk [vmem:[%s408_s1 + $0x48] sm:$0xff] %vm40_vm0, %v130_v16 }
  0xb2   :  { %v178_v17 = vpop.eup %177  ;;  %145 = vst.msk [vmem:[%s408_s1 + $0x40] sm:$0xff] %vm40_vm0, %v129_v44 }
  0xb3   :  { %v180_v45 = vpop.eup %179  ;;  %v132_v46 = vmul.f32 %v178_v17, %v280_v28 }
  0xb4   :  { %v131_v47 = vmul.f32 %v180_v45, %v285_v29 }
  0xb5   :  { %148 = vst.msk [vmem:[%s408_s1 + $0x58] sm:$0xff] %vm40_vm0, %v132_v46 }
  0xb6   :  { %v182_v22 = vpop.eup %181  ;;  %147 = vst.msk [vmem:[%s408_s1 + $0x50] sm:$0xff] %vm40_vm0, %v131_v47 }
  0xb7   :  { %v184_v23 = vpop.eup %183  ;;  %v134_v48 = vmul.f32 %v182_v22, %v296_v34 }
  0xb8   :  { %v133_v49 = vmul.f32 %v184_v23, %v301_v35 }
  0xb9   :  { %150 = vst.msk [vmem:[%s408_s1 + $0x68] sm:$0xff] %vm40_vm0, %v134_v48 }
  0xba   :  { %v186_v28 = vpop.eup %185  ;;  %149 = vst.msk [vmem:[%s408_s1 + $0x60] sm:$0xff] %vm40_vm0, %v133_v49 }
  0xbb   :  { %v188_v29 = vpop.eup %187  ;;  %v136_v50 = vmul.f32 %v186_v28, %v312_v40 }
  0xbc   :  { %v135_v51 = vmul.f32 %v188_v29, %v317_v41 }
  0xbd   :  { %152 = vst.msk [vmem:[%s408_s1 + $0x78] sm:$0xff] %vm40_vm0, %v136_v50 }
  0xbe   :  { %151 = vst.msk [vmem:[%s408_s1 + $0x70] sm:$0xff] %vm40_vm0, %v135_v51 }

</bundles_post_ra>
